<compile_context>
chip_gen: v5e
topology: v5e:2x2
jax: 0.10.0
libtpu: 0.0.40
codegen_flags: <defaults>
</compile_context>

<pallas_src>
import functools

import jax
import jax.numpy as jnp
from jax import lax
from jax.experimental import pallas as pl
from jax.experimental.pallas import tpu as pltpu

# Generous headroom below the smallest default scoped-VMEM limit (16 MiB on
# v5e) so the tile choice is safe on every chip generation.
_VMEM_BUDGET = 12 * 1024 * 1024


def _fourier_embed_kernel(x_ref, w_ref, o_ref):
    # x_ref: (tm, K), w_ref: (tn, K) (PyTorch Linear layout), o_ref: (tm, tn).
    # Contract on K; accumulate in f32 on the MXU.
    # (Downstream sin/cos Fourier-feature math could be fused here for free
    #  under the memory-bound regime, but the module's forward is just the
    #  bias-free Linear, so we keep its exact semantics.)
    o_ref[...] = lax.dot_general(
        x_ref[...],
        w_ref[...],
        dimension_numbers=(((1,), (1,)), ((), ())),
        preferred_element_type=jnp.float32,
    ).astype(o_ref.dtype)


def _auto_tn(n, k, itemsize):
    # Keep the whole (N, K) weight resident in VMEM whenever it comfortably
    # fits (typical for Fourier embeddings); otherwise tile N in 128-multiples.
    if 2 * n * k * itemsize <= _VMEM_BUDGET // 3:
        return n
    tn = 2048
    while tn > 128 and 2 * tn * k * itemsize > _VMEM_BUDGET // 3:
        tn //= 2
    return min(tn, n)


def _auto_tm(m, k, tn, itemsize):
    # Large M tiles amortize the ~0.35 us/step grid overhead and feed the MXU
    # full rows; shrink only if the double-buffered x/out tiles would blow VMEM.
    tm = 512
    while tm > 8 and 2 * tm * (k + tn) * itemsize > (2 * _VMEM_BUDGET) // 3:
        tm //= 2
    if m <= tm:
        return m  # single full-extent block (always layout-legal)
    return tm


@functools.partial(jax.jit, static_argnames=("tm", "tn"))
def fourier_embedding(x, weight, *, tm=None, tn=None):
    """Equivalent of `Linear(in_feats, out_feats, bias=False)(x)`.

    x:      (..., in_feats)
    weight: (out_feats, in_feats)   -- PyTorch Linear weight layout
    returns (..., out_feats)
    """
    *lead, k = x.shape
    n, kw = weight.shape
    assert kw == k

    m = 1
    for d in lead:
        m *= d
    x2d = x.reshape(m, k)

    itemsize = jnp.dtype(x.dtype).itemsize
    if tn is None:
        tn = _auto_tn(n, k, itemsize)
    if tm is None:
        tm = _auto_tm(m, k, tn, itemsize)

    grid = (pl.cdiv(m, tm), pl.cdiv(n, tn))

    cost = pl.CostEstimate(
        flops=2 * m * k * n,
        transcendentals=0,
        bytes_accessed=itemsize * (m * k + n * k + m * n),
    )

    y2d = pl.pallas_call(
        _fourier_embed_kernel,
        out_shape=jax.ShapeDtypeStruct((m, n), x.dtype),
        grid_spec=pltpu.PrefetchScalarGridSpec(
            num_scalar_prefetch=0,
            grid=grid,
            in_specs=[
                # x: new (tm, K) block per M step; constant across the N axis.
                pl.BlockSpec((tm, k), lambda i, j: (i, 0)),
                # weight: block index is constant when tn == n (usual case),
                # so the weight is DMA'd once and stays resident in VMEM.
                pl.BlockSpec((tn, k), lambda i, j: (j, 0)),
            ],
            # Lane-dense output tile (last dim = tn, normally all of out_feats)
            # -> wide unmasked vector stores on the HBM-write-bound path.
            out_specs=pl.BlockSpec((tm, tn), lambda i, j: (i, j)),
        ),
        compiler_params=pltpu.CompilerParams(
            dimension_semantics=("parallel", "parallel"),
        ),
        cost_estimate=cost,
    )(x2d, weight)

    return y2d.reshape(*lead, n)


if __name__ == "__main__":
    # Small, deterministic example consistent with the module's forward.
    in_feats, out_feats = 32, 128
    batch, seq = 2, 8

    key = jax.random.PRNGKey(0)
    kx, kw = jax.random.split(key)

    x = jax.random.normal(kx, (batch, seq, in_feats), dtype=jnp.float32)
    # PyTorch Linear default init: U(-1/sqrt(in_feats), 1/sqrt(in_feats))
    bound = 1.0 / (in_feats ** 0.5)
    weight = jax.random.uniform(
        kw, (out_feats, in_feats), dtype=jnp.float32, minval=-bound, maxval=bound
    )

    y = fourier_embedding(x, weight)
    y = jax.block_until_ready(y)

    # Reference check against plain JAX (same math as torch.nn.Linear, no bias).
    y_ref = jnp.einsum("bsk,nk->bsn", x, weight)
    assert y.shape == (batch, seq, out_feats)
    assert jnp.allclose(y, y_ref, atol=1e-5, rtol=1e-5)

    print("KERNEL_OK")
</pallas_src>

<mosaic_0001>
module attributes {stable_mosaic.version = 11 : i64} {
  func.func @_fourier_embed_kernel(%arg0: i32, %arg1: i32, %arg2: memref<16x32xf32, #tpu.memory_space<vmem>>, %arg3: memref<128x32xf32, #tpu.memory_space<vmem>>, %arg4: memref<16x128xf32, #tpu.memory_space<vmem>>) attributes {dimension_semantics = [#tpu.dimension_semantics<parallel>, #tpu.dimension_semantics<parallel>], iteration_bounds = array<i64: 1, 1>, scalar_prefetch = 0 : i64, scratch_operands = 0 : i64, tpu.core_type = #tpu.core_type<tc>, window_params = [{transform_indices = @transform_0, window_bounds = array<i64: 16, 32>}, {transform_indices = @transform_1, window_bounds = array<i64: 128, 32>}, {transform_indices = @transform_2, window_bounds = array<i64: 16, 128>}]} {
    %c0 = arith.constant 0 : index
    %c0_0 = arith.constant 0 : index
    %0 = vector.load %arg2[%c0, %c0_0] : memref<16x32xf32, #tpu.memory_space<vmem>>, vector<16x32xf32>
    %c0_1 = arith.constant 0 : index
    %c0_2 = arith.constant 0 : index
    %1 = vector.load %arg3[%c0_1, %c0_2] : memref<128x32xf32, #tpu.memory_space<vmem>>, vector<128x32xf32>
    %cst = arith.constant dense<0.000000e+00> : vector<16x128xf32>
    %2 = tpu.matmul %0, %1, %cst {dimension_numbers = #tpu.dot_dimension_numbers<[1], [1], [0], [0], [0, 0, 1, 0], [], []>} : vector<16x32xf32>, vector<128x32xf32>, vector<16x128xf32> -> vector<16x128xf32>
    %c0_3 = arith.constant 0 : index
    %c0_4 = arith.constant 0 : index
    %3 = vector.load %arg4[%c0_3, %c0_4] : memref<16x128xf32, #tpu.memory_space<vmem>>, vector<16x128xf32>
    tpu.vector_store %arg4[%c0_3, %c0_4], %2 {strides = array<i32>} : memref<16x128xf32, #tpu.memory_space<vmem>>, vector<16x128xf32>,
    return
  }
  func.func @transform_0(%arg0: i32, %arg1: i32) -> (i32, i32) {
    %c0_i32 = arith.constant 0 : i32
    %c0_i32_0 = arith.constant 0 : i32
    return %arg0, %c0_i32 : i32, i32
  }
  func.func @transform_1(%arg0: i32, %arg1: i32) -> (i32, i32) {
    %c0_i32 = arith.constant 0 : i32
    %c0_i32_0 = arith.constant 0 : i32
    return %arg1, %c0_i32 : i32, i32
  }
  func.func @transform_2(%arg0: i32, %arg1: i32) -> (i32, i32) {
    %c0_i32 = arith.constant 0 : i32
    return %arg0, %arg1 : i32, i32
  }
}

</mosaic_0001>

<bundles_post_ra>
// kernel: fourier_embedding.1
= control target key start
LH: loop header
LB: loop body
LE: loop exit
PB: predicated region body
PF: predicated region fallthrough
CT: control target
= control target key end

     0   :  { %vm30_vm0 = vcmask 261120   ;;  %s300_s0 = inlined_call_operand.vmem [shape: f32[16,32], index: 0, kind: input, shape index: {}]   ;;  %s301_s1 = inlined_call_operand.vmem [shape: f32[128,32], index: 1, kind: input, shape index: {}]   ;;  %s302_s2 = inlined_call_operand.hbm [shape: f32[16,128], index: 2, kind: output, shape index: {}]  }
   0x1   :  { %v29_v0 = vld [vmem:[%s301_s1 + $0x78] sm:$0xff]  ;;  %v28_v1 = vld [vmem:[%s301_s1 + $0x70] sm:$0xff] }
   0x2   :  { %128 = vmatpush.xpose.msk.msra.mxu0 %vm30_vm0, %v29_v0  ;;  %146 = vmatpush.xpose.msk.msra.mxu1 %vm30_vm0, %v29_v0 }
   0x3   :  { %7 = vsyncpa [#allocation3], 0  ;;  %v27_v2 = vld [vmem:[%s301_s1 + $0x68] sm:$0xff]  ;;  %v26_v3 = vld [vmem:[%s301_s1 + $0x60] sm:$0xff]  ;;  %s191_s17 = smov [#allocation2]   ;;  %s116_s20 = sshll.u32 %s302_s2, 4  ;;  %s117_s20 = int_to_ptr.hbm [resolvable:$true] %s116_s20 }
   0x4   :  { %v25_v4 = vld [vmem:[%s301_s1 + $0x58] sm:$0xff]  ;;  %v24_v5 = vld [vmem:[%s301_s1 + $0x50] sm:$0xff]  ;;  %v23_v6 = vld [vmem:[%s301_s1 + $0x48] sm:$0xff]  ;;  %s114_s18 = sshll.u32 %s191_s17, 4  ;;  %s192_s21 = smov 128   ;;  %s115_s18 = int_to_ptr.vmem [resolvable:$true] %s114_s18 }
   0x5   :  { %v22_v7 = vld [vmem:[%s301_s1 + $0x40] sm:$0xff]  ;;  %v21_v8 = vld [vmem:[%s301_s1 + $0x38] sm:$0xff]  ;;  %v20_v9 = vld [vmem:[%s301_s1 + $0x30] sm:$0xff]  ;;  %s193_s22 = smov 8  }
   0x6   :  { %129 = vmatpush.xpose.msk.msra.mxu0 %vm30_vm0, %v28_v1  ;;  %147 = vmatpush.xpose.msk.msra.mxu1 %vm30_vm0, %v28_v1  ;;  %v19_v10 = vld [vmem:[%s301_s1 + $0x28] sm:$0xff]  ;;  %v18_v11 = vld [vmem:[%s301_s1 + $0x20] sm:$0xff]  ;;  %v17_v12 = vld [vmem:[%s301_s1 + $0x18] sm:$0xff] }
   0x7   :  { %v16_v13 = vld [vmem:[%s301_s1 + $0x10] sm:$0xff]  ;;  %v15_v14 = vld [vmem:[%s301_s1 + $0x8] sm:$0xff]  ;;  %v14_v15 = vld [vmem:[%s301_s1] sm:$0xff] }
   0x8   :  { %v12_v16 = vld [vmem:[%s300_s0] sm:$0xff]  ;;  %v13_v17 = vld [vmem:[%s300_s0 + $0x8] sm:$0xff] }
   0xa   :  { %130 = vmatpush.xpose.msk.msra.mxu0 %vm30_vm0, %v27_v2  ;;  %148 = vmatpush.xpose.msk.msra.mxu1 %vm30_vm0, %v27_v2 }
   0xe   :  { %131 = vmatpush.xpose.msk.msra.mxu0 %vm30_vm0, %v26_v3  ;;  %149 = vmatpush.xpose.msk.msra.mxu1 %vm30_vm0, %v26_v3 }
  0x12   :  { %132 = vmatpush.xpose.msk.msra.mxu0 %vm30_vm0, %v25_v4  ;;  %150 = vmatpush.xpose.msk.msra.mxu1 %vm30_vm0, %v25_v4 }
  0x16   :  { %133 = vmatpush.xpose.msk.msra.mxu0 %vm30_vm0, %v24_v5  ;;  %151 = vmatpush.xpose.msk.msra.mxu1 %vm30_vm0, %v24_v5 }
  0x1a   :  { %134 = vmatpush.xpose.msk.msra.mxu0 %vm30_vm0, %v23_v6  ;;  %152 = vmatpush.xpose.msk.msra.mxu1 %vm30_vm0, %v23_v6 }
  0x1e   :  { %135 = vmatpush.xpose.msk.msra.mxu0 %vm30_vm0, %v22_v7  ;;  %153 = vmatpush.xpose.msk.msra.mxu1 %vm30_vm0, %v22_v7 }
  0x22   :  { %136 = vmatpush.xpose.msk.msra.mxu0 %vm30_vm0, %v21_v8  ;;  %154 = vmatpush.xpose.msk.msra.mxu1 %vm30_vm0, %v21_v8 }
  0x26   :  { %137 = vmatpush.xpose.msk.msra.mxu0 %vm30_vm0, %v20_v9  ;;  %155 = vmatpush.xpose.msk.msra.mxu1 %vm30_vm0, %v20_v9 }
  0x2a   :  { %138 = vmatpush.xpose.msk.msra.mxu0 %vm30_vm0, %v19_v10  ;;  %156 = vmatpush.xpose.msk.msra.mxu1 %vm30_vm0, %v19_v10 }
  0x2e   :  { %139 = vmatpush.xpose.msk.msra.mxu0 %vm30_vm0, %v18_v11  ;;  %157 = vmatpush.xpose.msk.msra.mxu1 %vm30_vm0, %v18_v11 }
  0x32   :  { %140 = vmatpush.xpose.msk.msra.mxu0 %vm30_vm0, %v17_v12  ;;  %158 = vmatpush.xpose.msk.msra.mxu1 %vm30_vm0, %v17_v12 }
  0x36   :  { %141 = vmatpush.xpose.msk.msra.mxu0 %vm30_vm0, %v16_v13  ;;  %159 = vmatpush.xpose.msk.msra.mxu1 %vm30_vm0, %v16_v13 }
  0x3a   :  { %142 = vmatpush.xpose.msk.msra.mxu0 %vm30_vm0, %v15_v14  ;;  %160 = vmatpush.xpose.msk.msra.mxu1 %vm30_vm0, %v15_v14 }
  0x3e   :  { %143 = vmatpush.xpose.msk.msra.mxu0 %vm30_vm0, %v14_v15  ;;  %161 = vmatpush.xpose.msk.msra.mxu1 %vm30_vm0, %v14_v15 }
  0x41   :  { %144 = vmatmul.msk.f32.vlgmr.msra.gmra.mxu0 %vm30_vm0, %v12_v16  ;;  %145 = vmatmul.msk.f32.vlgmr.msra.gmra.mxu1 %vm30_vm0, %v13_v17 }
  0xbe   :  { %v102_v18 = vpop.f32.mrf.mxu0  ;;  %v105_v19 = vpop.f32.mrf.mxu1 }
  0xbf   :  { %108 = vst [vmem:[#allocation2] sm:$0xff] %v102_v18 }
  0xc0   :  { %109 = vst [vmem:[#allocation2 + $0x8] sm:$0xff] %v105_v19 }
  0xc1   :  { %122 = dma.vmem_to_hbm [thread:$0]  %s115_s18, 256, %s117_s20, [#allocation3], %s192_s21, %s192_s21, %s193_s22  }
  0xc2   :  { %189 = dma.done.wait [#allocation3], 256  }
  0xc3   :  { %190 = vsyncadd [#allocation3], 4294967040 }
  0xc4   :  { %127 = vsyncpa [#allocation3], 1 }

</bundles_post_ra>
